<compile_context>
chip_gen: v7x
topology: tpu7x:2x2x1
jax: 0.10.0
libtpu: 0.0.40
codegen_flags: <defaults>
</compile_context>

<pallas_src>
import math

import jax
import jax.numpy as jnp
from jax.experimental import pallas as pl
from jax.experimental.pallas import tpu as pltpu

EPS = 1e-10
LANE = 128
_SUBLANE_PACK = {4: 8, 2: 16, 1: 32}  # itemsize -> min sublane tile


def _standardize_kernel(x_ref, mean_ref, std_ref, o_ref):
    # x_ref/o_ref: (TILE_R, TILE_C) tile; mean_ref/std_ref: (1, TILE_C) stats.
    mu = mean_ref[...].astype(jnp.float32)
    sd = std_ref[...].astype(jnp.float32)
    # One reciprocal on the stats row (EUP) + VPU multiplies, instead of
    # TILE_R * TILE_C divides.
    inv = pl.reciprocal(EPS + sd, approx=False)
    x = x_ref[...].astype(jnp.float32)
    o_ref[...] = ((x - mu) * inv).astype(o_ref.dtype)


def standardize(sample, means, stds, *, target_tile_bytes=2 * 1024 * 1024):
    """(sample - means) / (eps + stds) via a Pallas TPU kernel.

    sample: (..., F) float array; means/stds: (F,) stats.
    NOTE: for tiny inputs (a few KiB) a plain fused jnp expression is faster
    than any pallas_call; this wrapper always uses the kernel for clarity.
    """
    orig_shape = sample.shape
    F = orig_shape[-1]
    rows = math.prod(orig_shape[:-1]) if len(orig_shape) > 1 else 1

    dtype = sample.dtype
    itemsize = jnp.dtype(dtype).itemsize
    sublane = _SUBLANE_PACK.get(itemsize, 8)

    x2d = sample.reshape(rows, F)
    mean_row = means.reshape(1, F).astype(jnp.float32)
    std_row = stds.reshape(1, F).astype(jnp.float32)

    # --- make the last dim lane-dense (multiple of 128) ---------------------
    fold = 0
    if F < LANE and LANE % F == 0 and rows % (LANE // F) == 0 and rows >= LANE // F:
        # Fold consecutive rows into lanes: (rows, F) -> (rows/fold, 128).
        fold = LANE // F
        rows_p, F_p, pad_cols = rows // fold, LANE, 0
        x2d = x2d.reshape(rows_p, F_p)
        mean_row = jnp.tile(mean_row, (1, fold))
        std_row = jnp.tile(std_row, (1, fold))
    else:
        F_p = pl.cdiv(F, LANE) * LANE
        pad_cols = F_p - F
        rows_p = rows
        if pad_cols:
            x2d = jnp.pad(x2d, ((0, 0), (0, pad_cols)))
            mean_row = jnp.pad(mean_row, ((0, 0), (0, pad_cols)))
            # pad stds with 1.0 so the (discarded) padded lanes stay finite
            std_row = jnp.pad(std_row, ((0, 0), (0, pad_cols)), constant_values=1.0)

    # --- tile sizing ---------------------------------------------------------
    # Column tile: a multiple of 128, capped so very wide F doesn't blow VMEM.
    tile_c = min(F_p, 2048)
    # Row tile: ~target_tile_bytes per tile, multiple of the sublane pack
    # (8 for f32, 16 for bf16, 32 for int8) unless it covers the full extent.
    tile_r = max(sublane, target_tile_bytes // (tile_c * itemsize))
    tile_r = (tile_r // sublane) * sublane
    if tile_r >= rows_p:
        tile_r = rows_p  # full-extent block is always legal
    # Prefer >=2 grid steps so v7x's two TensorCores both get work.
    if pl.cdiv(rows_p, tile_r) * pl.cdiv(F_p, tile_c) < 2 and rows_p >= 2 * sublane:
        half = -(-((rows_p + 1) // 2) // sublane) * sublane
        tile_r = min(tile_r, half)

    grid = (pl.cdiv(rows_p, tile_r), pl.cdiv(F_p, tile_c))

    out2d = pl.pallas_call(
        _standardize_kernel,
        out_shape=jax.ShapeDtypeStruct((rows_p, F_p), dtype),
        grid_spec=pltpu.PrefetchScalarGridSpec(
            num_scalar_prefetch=0,
            grid=grid,
            in_specs=[
                pl.BlockSpec((tile_r, tile_c), lambda i, j: (i, j)),
                pl.BlockSpec((1, tile_c), lambda i, j: (0, j)),
                pl.BlockSpec((1, tile_c), lambda i, j: (0, j)),
            ],
            out_specs=pl.BlockSpec((tile_r, tile_c), lambda i, j: (i, j)),
        ),
        compiler_params=pltpu.CompilerParams(
            dimension_semantics=("parallel", "parallel"),
        ),
    )(x2d, mean_row, std_row)

    if fold:
        out = out2d.reshape(rows, F)
    elif pad_cols:
        out = out2d[:, :F]
    else:
        out = out2d
    return out.reshape(orig_shape)


if __name__ == "__main__":
    key = jax.random.PRNGKey(0)
    k_x, k_mean, k_std = jax.random.split(key, 3)

    # small shapes consistent with a per-feature standardizer over a signal
    batch, seq, features = 2, 8, 32
    x = jax.random.normal(k_x, (batch, seq, features), dtype=jnp.float32)

    # deterministic synthetic stats (the module normally np.load's these)
    # TODO(synk): stats are passed as arrays; no file I/O in the kernel path.
    means = jax.random.normal(k_mean, (features,), dtype=jnp.float32)
    stds = jnp.abs(jax.random.normal(k_std, (features,), dtype=jnp.float32)) + 0.5

    out = standardize(x, means, stds)
    out = jax.block_until_ready(out)

    ref = (x - means) / (EPS + stds)
    assert out.shape == x.shape
    assert jnp.allclose(out, ref, atol=1e-5, rtol=1e-5), float(
        jnp.max(jnp.abs(out - ref))
    )

    print("KERNEL_OK")
</pallas_src>

<mosaic_0001>
module attributes {stable_mosaic.version = 11 : i64} {
  func.func @_standardize_kernel(%arg0: i32, %arg1: i32, %arg2: memref<4x128xf32, #tpu.memory_space<vmem>>, %arg3: memref<1x128xf32, #tpu.memory_space<vmem>>, %arg4: memref<1x128xf32, #tpu.memory_space<vmem>>, %arg5: memref<4x128xf32, #tpu.memory_space<vmem>>) attributes {dimension_semantics = [#tpu.dimension_semantics<parallel>, #tpu.dimension_semantics<parallel>], iteration_bounds = array<i64: 1, 1>, scalar_prefetch = 0 : i64, scratch_operands = 0 : i64, tpu.core_type = #tpu.core_type<tc>, window_params = [{transform_indices = @transform_0, window_bounds = array<i64: 4, 128>}, {transform_indices = @transform_1, window_bounds = array<i64: 1, 128>}, {transform_indices = @transform_2, window_bounds = array<i64: 1, 128>}, {transform_indices = @transform_3, window_bounds = array<i64: 4, 128>}]} {
    %c0 = arith.constant 0 : index
    %c0_0 = arith.constant 0 : index
    %0 = vector.load %arg3[%c0, %c0_0] : memref<1x128xf32, #tpu.memory_space<vmem>>, vector<1x128xf32>
    %c0_1 = arith.constant 0 : index
    %c0_2 = arith.constant 0 : index
    %1 = vector.load %arg4[%c0_1, %c0_2] : memref<1x128xf32, #tpu.memory_space<vmem>>, vector<1x128xf32>
    %cst = arith.constant 1.000000e-10 : f32
    %2 = vector.broadcast %cst : f32 to vector<1x128xf32>
    %3 = arith.addf %2, %1 : vector<1x128xf32>
    %4 = tpu.reciprocal %3 : vector<1x128xf32> -> vector<1x128xf32>
    %c0_3 = arith.constant 0 : index
    %c0_4 = arith.constant 0 : index
    %5 = vector.load %arg2[%c0_3, %c0_4] : memref<4x128xf32, #tpu.memory_space<vmem>>, vector<4x128xf32>
    %6 = vector.broadcast %0 : vector<1x128xf32> to vector<4x128xf32>
    %7 = arith.subf %5, %6 : vector<4x128xf32>
    %8 = vector.broadcast %4 : vector<1x128xf32> to vector<4x128xf32>
    %9 = arith.mulf %7, %8 : vector<4x128xf32>
    %c0_5 = arith.constant 0 : index
    %c0_6 = arith.constant 0 : index
    %10 = vector.load %arg5[%c0_5, %c0_6] : memref<4x128xf32, #tpu.memory_space<vmem>>, vector<4x128xf32>
    tpu.vector_store %arg5[%c0_5, %c0_6], %9 {strides = array<i32>} : memref<4x128xf32, #tpu.memory_space<vmem>>, vector<4x128xf32>,
    return
  }
  func.func @transform_0(%arg0: i32, %arg1: i32) -> (i32, i32) {
    %c0_i32 = arith.constant 0 : i32
    return %arg0, %arg1 : i32, i32
  }
  func.func @transform_1(%arg0: i32, %arg1: i32) -> (i32, i32) {
    %c0_i32 = arith.constant 0 : i32
    %c0_i32_0 = arith.constant 0 : i32
    return %c0_i32, %arg1 : i32, i32
  }
  func.func @transform_2(%arg0: i32, %arg1: i32) -> (i32, i32) {
    %c0_i32 = arith.constant 0 : i32
    %c0_i32_0 = arith.constant 0 : i32
    return %c0_i32, %arg1 : i32, i32
  }
  func.func @transform_3(%arg0: i32, %arg1: i32) -> (i32, i32) {
    %c0_i32 = arith.constant 0 : i32
    return %arg0, %arg1 : i32, i32
  }
}

</mosaic_0001>

<bundles_post_ra>
// kernel: tpu_custom_call.1
= control target key start
LH: loop header
LB: loop body
LE: loop exit
PB: predicated region body
PF: predicated region fallthrough
CT: control target
= control target key end

     0   :  { %8 = vsyncpa [#allocation3], 0  ;;  %s167_s0 = inlined_call_operand.hbm [shape: f32[4,128], index: 0, kind: input, shape index: {}]   ;;  %s168_s1 = inlined_call_operand.vmem [shape: f32[1,128], index: 1, kind: input, shape index: {}]   ;;  %s169_s2 = inlined_call_operand.vmem [shape: f32[1,128], index: 2, kind: input, shape index: {}]   ;;  %s170_s3 = inlined_call_operand.hbm [shape: f32[4,128], index: 3, kind: output, shape index: {}]  }
   0x1   :  { %9 = vsyncpa [#allocation4], 0  ;;  %s115_s12 = smov [#allocation2]   ;;  %s67_s16 = scalar_lea.hbm %s167_s0, 64 }
   0x2   :  { %s16_s13 = sshll.u32 %s115_s12, 4  ;;  %p68_p0 = scmp.ne.s32.totalorder %s167_s0, %s67_s16  ;;  %s17_s13 = int_to_ptr.vmem [resolvable:$true] %s16_s13 }
   0x3   :  { %p71_p1 = scmp.lt.u32.totalorder %s67_s16, %s167_s0 }
   0x5   :  { %p73_p2 = pnand %p71_p1, %p68_p0 }
   0x7   :  { %76 = shalt.err (!%p73_p2)
}
   0x8   :  { %s77_s21 = scalar_lea.vmem %s17_s13, 64  ;;  %p82_p4 = scmp.lt.s32.totalorder %s17_s13, %s17_s13 }
   0x9   :  { %p78_p3 = scmp.ne.s32.totalorder %s17_s13, %s77_s21  ;;  %p83_p5 = scmp.lt.s32.totalorder %s77_s21, %s77_s21 }
   0xb   :  { %p84_p6 = por %p83_p5, %p82_p4 }
   0xd   :  { %p85_p7 = pnand %p84_p6, %p78_p3 }
   0xf   :  { %88 = shalt.err (!%p85_p7)
}
  0x10   :  { %19 = dma.hbm_to_vmem [thread:$0]  %s167_s0, 64, %s17_s13, [#allocation3]  }
  0x11   :  { %111 = dma.done.wait [#allocation3], 64  }
  0x12   :  { %112 = vsyncadd [#allocation3], 4294967232  ;;  %v28_v0 = vld [vmem:[%s169_s2] sm:$0x1]  ;;  %v40_v2 = vlaneseq  ;;  %s116_s28 = smov [#allocation5]  }
  0x13   :  { %v29_v1 = vadd.f32 1e-10, %v28_v0  ;;  %v62_v4 = vld [vmem:[%s168_s1] ss:$0 sm:$0xff]  ;;  %s53_s0 = sshll.u32 %s116_s28, 4  ;;  %s54_s0 = int_to_ptr.vmem [resolvable:$true] %s53_s0 }
  0x14   :  { %v41_v3 = vshrl.u32 %v40_v2, 7  ;;  %v31_v5 = vld [vmem:[#allocation2] sm:$0xf]  ;;  %s89_s29 = scalar_lea.vmem %s54_s0, 64  ;;  %p94_p9 = scmp.lt.s32.totalorder %s54_s0, %s54_s0 }
  0x15   :  { %65 = vrcp.f32 %v29_v1  ;;  %v38_v7 = vsub.f32 %v31_v5, %v62_v4  ;;  %p90_p8 = scmp.ne.s32.totalorder %s54_s0, %s89_s29  ;;  %p95_p10 = scmp.lt.s32.totalorder %s89_s29, %s89_s29 }
  0x16   :  { %v42_v6 = vsub.s32 0, %v41_v3 }
  0x17   :  { %p96_p11 = por %p95_p10, %p94_p9 }
  0x19   :  { %p97_p12 = pnand %p96_p11, %p90_p8 }
  0x1f   :  { %v66_v8 = vpop.eup %65 }
  0x20   :  { %v43_v9 = vrot.slane %v66_v8, %v42_v6 }
  0x22   :  { %v45_v10 = vmul.f32 %v43_v9, %v38_v7 }
  0x24   :  { %46 = vst [vmem:[#allocation5] sm:$0xf] %v45_v10 }
  0x25   :  { %100 = shalt.err (!%p97_p12)
}
  0x26   :  { %s101_s1 = scalar_lea.hbm %s170_s3, 64 }
  0x27   :  { %p102_p13 = scmp.ne.s32.totalorder %s170_s3, %s101_s1  ;;  %p105_p0 = scmp.lt.u32.totalorder %s101_s1, %s170_s3 }
  0x29   :  { %p107_p1 = pnand %p105_p0, %p102_p13 }
  0x2b   :  { %110 = shalt.err (!%p107_p1)
}
  0x2c   :  { %56 = dma.vmem_to_hbm [thread:$0]  %s54_s0, 64, %s170_s3, [#allocation4]  }
  0x2d   :  { %113 = dma.done.wait [#allocation4], 64  }
  0x2e   :  { %114 = vsyncadd [#allocation4], 4294967232 }
  0x2f   :  { %60 = vsyncpa [#allocation3], 1 }
  0x30   :  { %61 = vsyncpa [#allocation4], 1 }

</bundles_post_ra>
